<compile_context>
chip_gen: v7x
topology: tpu7x:2x2x1
jax: 0.10.0
libtpu: 0.0.40
codegen_flags: <defaults>
</compile_context>

<pallas_src>
import jax
import jax.numpy as jnp
from jax.experimental import pallas as pl
from jax.experimental.pallas import tpu as pltpu

VOCAB = 28
VOCAB_PAD = 32  # pad vocab axis to a multiple of 8 sublanes


def _round_up(a, b):
    return ((a + b - 1) // b) * b


def _embedding_kernel(idx_ref, table_ref, out_ref):
    """One grid step: embed a tile of token ids via one-hot @ table on the MXU.

    idx_ref:   (rows, P)       int32  -- P consecutive token ids per row
    table_ref: (VOCAB_PAD, H)  f32    -- full (padded) embedding table
    out_ref:   (rows, P*H)     f32    -- lane-dense packed output
    """
    rows, pack = idx_ref.shape
    vocab = table_ref.shape[0]

    ids = idx_ref[...]                       # (rows, P) int32
    tbl = table_ref[...]                     # (VOCAB_PAD, H)
    iota = jax.lax.broadcasted_iota(jnp.int32, (rows, vocab), 1)

    pieces = []
    for p in range(pack):                    # pack is a small static int -> unrolled
        one_hot = (ids[:, p : p + 1] == iota).astype(tbl.dtype)   # (rows, VOCAB_PAD)
        pieces.append(
            jnp.dot(one_hot, tbl, preferred_element_type=jnp.float32)
        )                                    # (rows, H), exact for a one-hot select
    out = pieces[0] if pack == 1 else jnp.concatenate(pieces, axis=-1)
    out_ref[...] = out.astype(out_ref.dtype)


def amino_acid_encode(x, table, *, tile_n=None):
    """Pallas equivalent of Amino_Acid.forward (nn.Embedding(28, H) lookup).

    x:     (B, S) int32 token ids in [0, VOCAB)
    table: (VOCAB, H) float32 embedding weights
    returns (B, S, H) float32
    """
    B, S = x.shape
    H = table.shape[1]
    N = B * S

    # Pack factor: group P consecutive tokens per output row so the output
    # block's last dim is >= 128 lanes (full-width stores). If H >= 128 (or
    # doesn't divide 128) keep P = 1.
    P = 128 // H if (H < 128 and 128 % H == 0) else 1
    align = 8 * P  # packed row count per tile must stay a multiple of 8 sublanes

    if tile_n is None:
        # ~4 MiB f32 output block, capped at 2048 tokens: double-buffered it
        # fits the scoped-VMEM defaults of v5e/v6e/v7x with plenty of headroom.
        row_bytes = H * 4
        tile_n = min(2048, max(align, (4 << 20) // row_bytes))
    tile_n = max(align, (tile_n // align) * align)
    tile_n = min(tile_n, _round_up(N, align))  # don't over-pad tiny inputs

    n_pad = _round_up(N, tile_n)
    rows = tile_n // P

    # Glue (plain JAX): pad vocab axis, pad/flatten ids, pack P ids per row.
    table_padded = jnp.zeros((VOCAB_PAD, H), table.dtype).at[:VOCAB].set(table)
    idx_flat = jnp.zeros((n_pad,), jnp.int32).at[:N].set(x.reshape(N).astype(jnp.int32))
    idx_packed = idx_flat.reshape(n_pad // P, P)

    grid = (n_pad // tile_n,)
    out = pl.pallas_call(
        _embedding_kernel,
        out_shape=jax.ShapeDtypeStruct((n_pad // P, P * H), jnp.float32),
        grid_spec=pltpu.PrefetchScalarGridSpec(
            num_scalar_prefetch=0,
            grid=grid,
            in_specs=[
                pl.BlockSpec((rows, P), lambda i: (i, 0)),        # packed ids tile
                pl.BlockSpec((VOCAB_PAD, H), lambda i: (0, 0)),   # full table (fetched once)
            ],
            out_specs=pl.BlockSpec((rows, P * H), lambda i: (i, 0)),
        ),
        compiler_params=pltpu.CompilerParams(
            dimension_semantics=("parallel",),
        ),
    )(idx_packed, table_padded)

    # Unpack: (n_pad/P, P*H) -> (n_pad, H) -> drop padding -> (B, S, H)
    return out.reshape(n_pad, H)[:N].reshape(B, S, H)


if __name__ == "__main__":
    # Small deterministic setup consistent with the module: batch=2, seq=8, hid_dim=32.
    B, S, H = 2, 8, 32
    key = jax.random.PRNGKey(0)
    k_emb, k_idx = jax.random.split(key)

    # nn.Embedding default init: N(0, 1)
    table = jax.random.normal(k_emb, (VOCAB, H), dtype=jnp.float32)
    x = jax.random.randint(k_idx, (B, S), 0, VOCAB, dtype=jnp.int32)

    emb = amino_acid_encode(x, table)
    emb = jax.block_until_ready(emb)

    # Reference check (plain JAX gather).
    ref = jnp.take(table, x, axis=0)
    assert emb.shape == (B, S, H)
    assert jnp.allclose(emb, ref, atol=1e-6), "mismatch vs reference embedding"

    print("KERNEL_OK")
</pallas_src>

<mosaic_0001>
module attributes {stable_mosaic.version = 11 : i64} {
  func.func @_embedding_kernel(%arg0: i32, %arg1: memref<8x4xi32, #tpu.memory_space<vmem>>, %arg2: memref<32x32xf32, #tpu.memory_space<vmem>>, %arg3: memref<8x128xf32, #tpu.memory_space<vmem>>) attributes {dimension_semantics = [#tpu.dimension_semantics<parallel>], iteration_bounds = array<i64: 1>, scalar_prefetch = 0 : i64, scratch_operands = 0 : i64, tpu.core_type = #tpu.core_type<tc>, window_params = [{transform_indices = @transform_0, window_bounds = array<i64: 8, 4>}, {pipeline_mode = #tpu.pipeline_mode<synchronous>, transform_indices = @transform_1, window_bounds = array<i64: 32, 32>}, {transform_indices = @transform_2, window_bounds = array<i64: 8, 128>}]} {
    %c0 = arith.constant 0 : index
    %c0_0 = arith.constant 0 : index
    %0 = vector.load %arg1[%c0, %c0_0] : memref<8x4xi32, #tpu.memory_space<vmem>>, vector<8x4xi32>
    %c0_1 = arith.constant 0 : index
    %c0_2 = arith.constant 0 : index
    %1 = vector.load %arg2[%c0_1, %c0_2] : memref<32x32xf32, #tpu.memory_space<vmem>>, vector<32x32xf32>
    %2 = tpu.iota {dimensions = array<i32: 1>} : vector<8x32xi32>
    %3 = vector.extract_strided_slice %0 {offsets = [0, 0], sizes = [8, 1], strides = [1, 1]} : vector<8x4xi32> to vector<8x1xi32>
    %4 = vector.broadcast %3 : vector<8x1xi32> to vector<8x32xi32>
    %5 = arith.cmpi eq, %4, %2 : vector<8x32xi32>
    %6 = arith.extui %5 : vector<8x32xi1> to vector<8x32xi32>
    %7 = arith.sitofp %6 : vector<8x32xi32> to vector<8x32xf32>
    %cst = arith.constant dense<0.000000e+00> : vector<8x32xf32>
    %8 = tpu.matmul %7, %1, %cst {dimension_numbers = #tpu.dot_dimension_numbers<[1], [0], [0], [1], [0, 0, 1, 1], [], []>} : vector<8x32xf32>, vector<32x32xf32>, vector<8x32xf32> -> vector<8x32xf32>
    %9 = vector.extract_strided_slice %0 {offsets = [0, 1], sizes = [8, 1], strides = [1, 1]} : vector<8x4xi32> to vector<8x1xi32>
    %10 = vector.broadcast %9 : vector<8x1xi32> to vector<8x32xi32>
    %11 = arith.cmpi eq, %10, %2 : vector<8x32xi32>
    %12 = arith.extui %11 : vector<8x32xi1> to vector<8x32xi32>
    %13 = arith.sitofp %12 : vector<8x32xi32> to vector<8x32xf32>
    %cst_3 = arith.constant dense<0.000000e+00> : vector<8x32xf32>
    %14 = tpu.matmul %13, %1, %cst_3 {dimension_numbers = #tpu.dot_dimension_numbers<[1], [0], [0], [1], [0, 0, 1, 1], [], []>} : vector<8x32xf32>, vector<32x32xf32>, vector<8x32xf32> -> vector<8x32xf32>
    %15 = vector.extract_strided_slice %0 {offsets = [0, 2], sizes = [8, 1], strides = [1, 1]} : vector<8x4xi32> to vector<8x1xi32>
    %16 = vector.broadcast %15 : vector<8x1xi32> to vector<8x32xi32>
    %17 = arith.cmpi eq, %16, %2 : vector<8x32xi32>
    %18 = arith.extui %17 : vector<8x32xi1> to vector<8x32xi32>
    %19 = arith.sitofp %18 : vector<8x32xi32> to vector<8x32xf32>
    %cst_4 = arith.constant dense<0.000000e+00> : vector<8x32xf32>
    %20 = tpu.matmul %19, %1, %cst_4 {dimension_numbers = #tpu.dot_dimension_numbers<[1], [0], [0], [1], [0, 0, 1, 1], [], []>} : vector<8x32xf32>, vector<32x32xf32>, vector<8x32xf32> -> vector<8x32xf32>
    %21 = vector.extract_strided_slice %0 {offsets = [0, 3], sizes = [8, 1], strides = [1, 1]} : vector<8x4xi32> to vector<8x1xi32>
    %22 = vector.broadcast %21 : vector<8x1xi32> to vector<8x32xi32>
    %23 = arith.cmpi eq, %22, %2 : vector<8x32xi32>
    %24 = arith.extui %23 : vector<8x32xi1> to vector<8x32xi32>
    %25 = arith.sitofp %24 : vector<8x32xi32> to vector<8x32xf32>
    %cst_5 = arith.constant dense<0.000000e+00> : vector<8x32xf32>
    %26 = tpu.matmul %25, %1, %cst_5 {dimension_numbers = #tpu.dot_dimension_numbers<[1], [0], [0], [1], [0, 0, 1, 1], [], []>} : vector<8x32xf32>, vector<32x32xf32>, vector<8x32xf32> -> vector<8x32xf32>
    %27 = tpu.concatenate %8, %14, %20, %26 in 1 : vector<8x32xf32>, vector<8x32xf32>, vector<8x32xf32>, vector<8x32xf32> -> vector<8x128xf32>
    %c0_6 = arith.constant 0 : index
    %c0_7 = arith.constant 0 : index
    %28 = vector.load %arg3[%c0_6, %c0_7] : memref<8x128xf32, #tpu.memory_space<vmem>>, vector<8x128xf32>
    tpu.vector_store %arg3[%c0_6, %c0_7], %27 {strides = array<i32>} : memref<8x128xf32, #tpu.memory_space<vmem>>, vector<8x128xf32>,
    return
  }
  func.func @transform_0(%arg0: i32) -> (i32, i32) {
    %c0_i32 = arith.constant 0 : i32
    %c0_i32_0 = arith.constant 0 : i32
    return %arg0, %c0_i32 : i32, i32
  }
  func.func @transform_1(%arg0: i32) -> (i32, i32) {
    %c0_i32 = arith.constant 0 : i32
    %c0_i32_0 = arith.constant 0 : i32
    %c0_i32_1 = arith.constant 0 : i32
    return %c0_i32, %c0_i32_0 : i32, i32
  }
  func.func @transform_2(%arg0: i32) -> (i32, i32) {
    %c0_i32 = arith.constant 0 : i32
    %c0_i32_0 = arith.constant 0 : i32
    return %arg0, %c0_i32 : i32, i32
  }
}

</mosaic_0001>

<bundles_post_ra>
// kernel: tpu_custom_call.1
= control target key start
LH: loop header
LB: loop body
LE: loop exit
PB: predicated region body
PF: predicated region fallthrough
CT: control target
= control target key end

     0   :  { %7 = vsyncpa [#allocation3], 0  ;;  %s611_s0 = inlined_call_operand.vmem [shape: s32[8,4], index: 0, kind: input, shape index: {}]   ;;  %s612_s1 = inlined_call_operand.hbm [shape: f32[32,32], index: 1, kind: input, shape index: {}]   ;;  %s613_s2 = inlined_call_operand.hbm [shape: f32[8,128], index: 2, kind: output, shape index: {}]  }
   0x1   :  { %8 = vsyncpa [#allocation4], 0  ;;  %s546_s9 = smov [#allocation2]   ;;  %s498_s13 = scalar_lea.hbm %s612_s1, 512 }
   0x2   :  { %s16_s10 = sshll.u32 %s546_s9, 4  ;;  %p499_p0 = scmp.ne.s32.totalorder %s612_s1, %s498_s13  ;;  %s17_s10 = int_to_ptr.vmem [resolvable:$true] %s16_s10 }
   0x3   :  { %p502_p1 = scmp.lt.u32.totalorder %s498_s13, %s612_s1 }
   0x5   :  { %p504_p2 = pnand %p502_p1, %p499_p0 }
   0x7   :  { %507 = shalt.err (!%p504_p2)
}
   0x8   :  { %s508_s18 = scalar_lea.vmem %s17_s10, 512  ;;  %p513_p4 = scmp.lt.s32.totalorder %s17_s10, %s17_s10 }
   0x9   :  { %p509_p3 = scmp.ne.s32.totalorder %s17_s10, %s508_s18  ;;  %p514_p5 = scmp.lt.s32.totalorder %s508_s18, %s508_s18 }
   0xb   :  { %p515_p6 = por %p514_p5, %p513_p4 }
   0xd   :  { %p516_p7 = pnand %p515_p6, %p509_p3 }
   0xf   :  { %519 = shalt.err (!%p516_p7)
}
  0x10   :  { %s547_s19 = smov 128   ;;  %s548_s20 = smov 8  }
  0x11   :  { %22 = dma.hbm_to_vmem [thread:$0]  %s612_s1, 512, %s17_s10, [#allocation3], %s547_s19, %s547_s19, %s548_s20  }
  0x12   :  { %542 = dma.done.wait [#allocation3], 512  }
  0x13   :  { %543 = vsyncadd [#allocation3], 4294966784  ;;  %v549_v0 = vmov 0   ;;  %v550_v1 = vmov 2   ;;  %v551_v2 = vmov 0.0|0.0   ;;  %v26_v3 = vld [vmem:[%s611_s0] sm:$0xff]  ;;  %v31_v13 = vlaneseq }
  0x14   :  { %493 = vset.pattern.permute.xlu0 %v549_v0  ;;  %495 = vset.pattern.permute.xlu1 %v550_v1  ;;  %v27_v4 = vld [vmem:[#allocation2] sm:$0xff]  ;;  %v28_v5 = vld [vmem:[#allocation2 + $0x8] sm:$0xff]  ;;  %v29_v7 = vld [vmem:[#allocation2 + $0x10] sm:$0xff]  ;;  %vm552_vm0 = vmmov 0   ;;  %v553_v9 = vmov 0.0   ;;  %v554_v11 = vmov 1  }
  0x15   :  { %455 = vmatprep.subr.bf16.mxu0 %v551_v2  ;;  %461 = vmatprep.subr.bf16.mxu1 %v551_v2  ;;  %v456_v6 = vpack.c.bf16 %v28_v5, %v27_v4  ;;  %v30_v8 = vld [vmem:[#allocation2 + $0x18] sm:$0xff]  ;;  %v555_v12 = vmov 3   ;;  %v32_v14 = vand.u32 127, %v31_v13  ;;  %vm39_vm1 = vcmask 261120   ;;  %s556_s0 = smov 32   ;;  %s557_s1 = smov 64  }
  0x16   :  { %34 = vperm.xlu0 %493, %v26_v3   ;;  %193 = vperm.xlu1 %495, %v26_v3   ;;  %v459_v10 = vpack.c.bf16 %v30_v8, %v29_v7  ;;  %s558_s25 = smov 96   ;;  %vm363_vm6 = vcmask 523264   ;;  %s559_s26 = smov [#allocation5]   ;;  %vm365_vm7 = vcmask 785408  }
  0x17   :  { %419 = vmatprep.mubr.msk.f32.mxu0 %vm552_vm0, %v553_v9  ;;  %430 = vmatprep.mubr.msk.f32.mxu1 %vm552_vm0, %v553_v9  ;;  %s374_s27 = sshll.u32 %s559_s26, 4  ;;  %s375_s27 = int_to_ptr.vmem [resolvable:$true] %s374_s27 }
  0x18   :  { %457 = vmatpush3.bf16.msra.mxu0 %v456_v6  ;;  %463 = vmatpush3.bf16.msra.mxu1 %v456_v6  ;;  %s520_s28 = scalar_lea.vmem %s375_s27, 128  ;;  %p525_p9 = scmp.lt.s32.totalorder %s375_s27, %s375_s27 }
  0x19   :  { %458 = vmatprep.subr.bf16.mxu0 %v551_v2  ;;  %464 = vmatprep.subr.bf16.mxu1 %v551_v2  ;;  %p521_p8 = scmp.ne.s32.totalorder %s375_s27, %s520_s28  ;;  %p526_p10 = scmp.lt.s32.totalorder %s520_s28, %s520_s28 }
  0x1a   :  { %494 = vset.pattern.permute.xlu0 %v554_v11  ;;  %496 = vset.pattern.permute.xlu1 %v555_v12 }
  0x1b   :  { %114 = vperm.xlu0 %494, %v26_v3   ;;  %272 = vperm.xlu1 %496, %v26_v3   ;;  %p527_p11 = por %p526_p10, %p525_p9 }
  0x1c   :  { %460 = vmatpush3.bf16.msra.mxu0 %v459_v10  ;;  %466 = vmatpush3.bf16.msra.mxu1 %v459_v10 }
  0x1d   :  { %467 = vmatprep.subr.bf16.mxu0 %v551_v2  ;;  %473 = vmatprep.subr.bf16.mxu1 %v551_v2  ;;  %p528_p12 = pnand %p527_p11, %p521_p8 }
  0x1f   :  { %497 = vset.pattern.permute.xlu0 %v555_v12 }
  0x95   :  { %v35_v15 = vpop.permute.xlu0 %34  ;;  %v194_v16 = vpop.permute.xlu1 %193 }
  0x96   :  { %vm36_vm2 = vcmp.eq.s32.totalorder %v35_v15, %v32_v14  ;;  %vm195_vm3 = vcmp.eq.s32.totalorder %v194_v16, %v32_v14 }
  0x97   :  { %v383_v17 = vsel %vm36_vm2, 1.0, %v553_v9  ;;  %v387_v21 = vsel %vm195_vm3, 1.0, %v553_v9 }
  0x98   :  { %420 = vmatmul.mubr.msk.f32.vlgmr.msra.gmra.mrb[0].mxu0 %vm39_vm1, %v383_v17 }
  0x99   :  { %469 = vmatpush3.bf16.msra.mxu0 %v456_v6  ;;  %441 = vmatprep.mubr.msk.f32.mxu0 %vm552_vm0, %v553_v9 }
  0x9a   :  { %v115_v18 = vpop.permute.xlu0 %114  ;;  %470 = vmatprep.subr.bf16.mxu0 %v551_v2  ;;  %v273_v20 = vpop.permute.xlu1 %272 }
  0x9b   :  { %vm116_vm4 = vcmp.eq.s32.totalorder %v115_v18, %v32_v14  ;;  %vm274_vm5 = vcmp.eq.s32.totalorder %v273_v20, %v32_v14 }
  0x9c   :  { %v385_v19 = vsel %vm116_vm4, 1.0, %v553_v9  ;;  %v389_v22 = vsel %vm274_vm5, 1.0, %v553_v9 }
  0x9d   :  { %472 = vmatpush3.bf16.msra.mxu0 %v459_v10  ;;  %431 = vmatmul.mubr.msk.f32.vlgmr.msra.gmra.mrb[0].mxu1 %vm39_vm1, %v385_v19 }
  0x9e   :  { %475 = vmatpush3.bf16.msra.mxu1 %v456_v6  ;;  %452 = vmatprep.mubr.msk.f32.mxu1 %vm552_vm0, %v553_v9 }
  0x9f   :  { %476 = vmatprep.subr.bf16.mxu1 %v551_v2 }
  0xa0   :  { %442 = vmatmul.mubr.msk.f32.vlgmr.msra.gmra.mrb[2].mxu0 %vm39_vm1, %v387_v21 }
  0xa2   :  { %478 = vmatpush3.bf16.msra.mxu1 %v459_v10 }
  0xa5   :  { %453 = vmatmul.mubr.msk.f32.vlgmr.msra.gmra.mrb[2].mxu1 %vm39_vm1, %v389_v22 }
 0x16b   :  { %v109_v23 = vpop.f32.mrb[0].mxu0 }
 0x16c   :  { %v421_v24 = vpop.f32.mrb[1].mxu0 }
 0x170   :  { %v188_v25 = vpop.f32.mrb[0].mxu1 }
 0x171   :  { %351 = vrot.lane.b32.xlu1 %v188_v25, %s556_s0  ;;  %v432_v26 = vpop.f32.mrb[1].mxu1 }
 0x173   :  { %v267_v27 = vpop.f32.mrb[2].mxu0 }
 0x174   :  { %355 = vrot.lane.b32.xlu0 %v267_v27, %s557_s1  ;;  %v443_v28 = vpop.f32.mrb[3].mxu0 }
 0x178   :  { %v346_v29 = vpop.f32.mrb[2].mxu1 }
 0x179   :  { %359 = vrot.lane.b32.xlu1 %v346_v29, %s558_s25  ;;  %v454_v30 = vpop.f32.mrb[3].mxu1 }
 0x1e3   :  { %v352_v31 = vpop.permute.xlu1 %351 }
 0x1e4   :  { %v362_v32 = vsel %vm39_vm1, %v109_v23, %v352_v31 }
 0x1e6   :  { %v356_v33 = vpop.permute.xlu0 %355 }
 0x1e7   :  { %v364_v34 = vsel %vm363_vm6, %v362_v32, %v356_v33 }
 0x1eb   :  { %v360_v35 = vpop.permute.xlu1 %359 }
 0x1ec   :  { %v366_v36 = vsel %vm365_vm7, %v364_v34, %v360_v35 }
 0x1ed   :  { %367 = vst [vmem:[#allocation5] sm:$0xff] %v366_v36 }
 0x1ee   :  { %531 = shalt.err (!%p528_p12)
}
 0x1ef   :  { %s532_s3 = scalar_lea.hbm %s613_s2, 128 }
 0x1f0   :  { %p533_p13 = scmp.ne.s32.totalorder %s613_s2, %s532_s3  ;;  %p536_p0 = scmp.lt.u32.totalorder %s532_s3, %s613_s2 }
 0x1f2   :  { %p538_p1 = pnand %p536_p0, %p533_p13 }
 0x1f4   :  { %541 = shalt.err (!%p538_p1)
}
 0x1f5   :  { %377 = dma.vmem_to_hbm [thread:$0]  %s375_s27, 128, %s613_s2, [#allocation4]  }
 0x1f6   :  { %544 = dma.done.wait [#allocation4], 128  }
 0x1f7   :  { %545 = vsyncadd [#allocation4], 4294967168 }
 0x1f8   :  { %381 = vsyncpa [#allocation3], 1 }
 0x1f9   :  { %382 = vsyncpa [#allocation4], 1 }

</bundles_post_ra>
